<compile_context>
chip_gen: v5e
topology: v5e:2x2
jax: 0.10.0
libtpu: 0.0.40
codegen_flags: <defaults>
</compile_context>

<pallas_src>
import jax
import jax.numpy as jnp
from jax.experimental import pallas as pl
from jax.experimental.pallas import tpu as pltpu


def _make_genloss_kernel(n_splits, tiles_per_split, tile_w, rem, ragged):
    """Builds the reduction kernel (static tiling params captured by closure)."""

    def kernel(out_ref, tgt_ref, diff_ref, nz_ref):
        # out_ref/tgt_ref: (1, rows, tile_w) input tiles.
        # diff_ref/nz_ref: (1, rows, 1) resident accumulators (same output
        # block across the innermost reduction axis t).
        s = pl.program_id(1)
        t = pl.program_id(2)

        @pl.when(t == 0)
        def _():
            diff_ref[...] = jnp.zeros_like(diff_ref)
            nz_ref[...] = jnp.zeros_like(nz_ref)

        out = out_ref[...].astype(jnp.float32)
        tgt = tgt_ref[...].astype(jnp.float32)

        absdiff = jnp.abs(out - tgt)
        nz = (tgt != 0.0).astype(jnp.float32)  # NaN != 0 -> counted (matches torch.any)

        if ragged:
            # Only the globally-last tile overhangs the true spatial extent;
            # edge-block padding contents are undefined, so mask it out.
            is_last = jnp.logical_and(s == n_splits - 1, t == tiles_per_split - 1)
            limit = jnp.where(is_last, jnp.int32(rem), jnp.int32(tile_w))
            lane = jax.lax.broadcasted_iota(jnp.int32, absdiff.shape, 2)
            keep = (lane < limit).astype(jnp.float32)
            absdiff = absdiff * keep
            nz = nz * keep

        diff_ref[...] += jnp.sum(absdiff, axis=-1, keepdims=True)
        nz_ref[...] += jnp.sum(nz, axis=-1, keepdims=True)

    return kernel


def gen_loss(out_images, target_images, epoch=0, *, per_buf_budget=6 * 1024 * 1024):
    # `epoch` is accepted but unused, exactly like the PyTorch forward.
    del epoch
    N, C, H, W = target_images.shape
    hw = H * W
    dtype = target_images.dtype
    itemsize = jnp.dtype(dtype).itemsize

    # ---- sublane folding for small channel counts -------------------------
    # (N, C, hw) -> (N, C*8, hw/8) is a free row-major reshape and fills all 8
    # f32 sublanes of each vreg when C < 8.
    fold = 8 if (C < 8 and hw % 8 == 0) else 1
    rows = C * fold
    cols = hw // fold

    out_flat = out_images.reshape(N, rows, cols)
    tgt_flat = target_images.reshape(N, rows, cols)

    # ---- lane-dense spatial tile, no input padding -------------------------
    # Per-buffer VMEM footprint ~= rows_pad * tile_w * itemsize (sublane pack
    # depends on dtype: f32 -> 8 rows/vreg, bf16 -> 16, int8/fp8 -> 32).
    sub_pack = 8 * max(1, 4 // itemsize)
    rows_pad = ((rows + sub_pack - 1) // sub_pack) * sub_pack
    t_cap = max(128, (per_buf_budget // (rows_pad * itemsize)) // 128 * 128)

    if cols <= t_cap:
        tile_w = cols            # full axis in one block (no (·,128) constraint)
        num_tiles = 1
    else:
        divisor = 0
        for cand in range(t_cap, 127, -128):   # largest mult-of-128 divisor <= cap
            if cols % cand == 0:
                divisor = cand
                break
        if divisor >= max(128, t_cap // 2):
            tile_w = divisor                    # exact tiling, no masking needed
        else:
            tile_w = t_cap                      # cdiv tiling, mask ragged tail
        num_tiles = pl.cdiv(cols, tile_w)
    ragged = (num_tiles * tile_w != cols)
    rem = cols - (num_tiles - 1) * tile_w       # valid lanes in the last tile

    # ---- split spatial tiles across both v7x TensorCores when N == 1 -------
    n_splits = 2 if (N == 1 and num_tiles >= 2 and num_tiles % 2 == 0) else 1
    tiles_per_split = num_tiles // n_splits

    # ---- computed scoped-VMEM limit (safe on v5e/v6e/v7x) -------------------
    num_bufs = 2                                 # default double-buffering
    in_bytes = 2 * num_bufs * rows_pad * tile_w * itemsize
    out_bytes = 2 * num_bufs * rows_pad * 128 * 4
    vmem_limit = int(max(16 << 20, in_bytes + out_bytes + (4 << 20)))

    cost = pl.CostEstimate(
        flops=5 * N * C * hw,
        transcendentals=0,
        bytes_accessed=2 * N * C * hw * itemsize,
    )

    kernel = _make_genloss_kernel(n_splits, tiles_per_split, tile_w, rem, ragged)

    diff_sums, nz_counts = pl.pallas_call(
        kernel,
        out_shape=(
            jax.ShapeDtypeStruct((N * n_splits, rows, 1), jnp.float32),
            jax.ShapeDtypeStruct((N * n_splits, rows, 1), jnp.float32),
        ),
        grid_spec=pltpu.PrefetchScalarGridSpec(
            num_scalar_prefetch=0,
            grid=(N, n_splits, tiles_per_split),
            in_specs=[
                pl.BlockSpec((1, rows, tile_w),
                             lambda i, s, t: (i, 0, s * tiles_per_split + t)),
                pl.BlockSpec((1, rows, tile_w),
                             lambda i, s, t: (i, 0, s * tiles_per_split + t)),
            ],
            out_specs=[
                pl.BlockSpec((1, rows, 1), lambda i, s, t: (i * n_splits + s, 0, 0)),
                pl.BlockSpec((1, rows, 1), lambda i, s, t: (i * n_splits + s, 0, 0)),
            ],
        ),
        compiler_params=pltpu.CompilerParams(
            dimension_semantics=("parallel", "parallel", "arbitrary"),
            vmem_limit_bytes=vmem_limit,
        ),
        cost_estimate=cost,
    )(out_flat, tgt_flat)

    # ---- tiny finalize in plain JAX (O(N*C) work) ---------------------------
    diff = diff_sums.reshape(N, n_splits, C, fold).sum(axis=(1, 3))   # (N, C) sum|out-tgt|
    nz = nz_counts.reshape(N, n_splits, C, fold).sum(axis=(1, 3))     # (N, C) #nonzero tgt

    valid = (nz > 0.0).astype(jnp.float32)           # == torch.any(tgt != 0)
    mean_l1 = diff * (1.0 / jnp.float32(hw))         # divide by true H*W
    total = jnp.sum(valid * mean_l1, axis=1)         # per-pair masked sum
    cnt = jnp.sum(valid, axis=1)
    # When cnt == 0, total is also 0, matching PyTorch's "append 0" behavior.
    pair_loss = total / jnp.maximum(cnt, 1.0)
    return jnp.sum(pair_loss) / jnp.float32(max(N, 1))


def gen_loss_ref(out_images, target_images):
    # Pure-JAX reference mirroring the PyTorch forward.
    N, C, _, _ = target_images.shape
    pair_losses = []
    for p in range(N):
        total = 0.0
        cnt = 0.0
        for c in range(C):
            valid = jnp.any(target_images[p, c] != 0).astype(jnp.float32)
            l1 = jnp.mean(jnp.abs(out_images[p, c] - target_images[p, c]))
            total = total + valid * l1
            cnt = cnt + valid
        pair_losses.append(jnp.where(cnt > 0, total / jnp.maximum(cnt, 1.0), 0.0))
    return sum(pair_losses) / max(len(pair_losses), 1)


def _check(out_images, target_images, **kw):
    loss = jax.block_until_ready(gen_loss(out_images, target_images, epoch=0, **kw))
    ref = jax.block_until_ready(gen_loss_ref(out_images, target_images))
    assert jnp.allclose(loss, ref, atol=1e-5, rtol=1e-5), (loss, ref)


if __name__ == "__main__":
    key = jax.random.PRNGKey(0)

    # 1) Main case: sublane-folded, single spatial tile, N=2 parallel pairs.
    k1, k2, key = jax.random.split(key, 3)
    N, C, H, W = 2, 4, 16, 16
    out_images = jax.random.normal(k1, (N, C, H, W), dtype=jnp.float32)
    target_images = jax.random.normal(k2, (N, C, H, W), dtype=jnp.float32)
    target_images = target_images.at[0, 1].set(0.0)
    target_images = target_images.at[1, 0].set(0.0)
    target_images = target_images.at[1, 3].set(0.0)
    _check(out_images, target_images)

    # 2) Ragged-tail path (cols % 128 != 0, tiny forced budget so cols > t_cap).
    k1, k2, key = jax.random.split(key, 3)
    o2 = jax.random.normal(k1, (1, 4, 33, 33), dtype=jnp.float32)
    t2 = jax.random.normal(k2, (1, 4, 33, 33), dtype=jnp.float32)
    t2 = t2.at[0, 2].set(0.0)
    _check(o2, t2, per_buf_budget=4 * 128 * 4)

    # 3) N == 1 with an even tile count -> spatial split across two 'parallel'
    #    grid steps (both v7x TensorCores), tiny forced budget.
    k1, k2, key = jax.random.split(key, 3)
    o3 = jax.random.normal(k1, (1, 4, 32, 64), dtype=jnp.float32)
    t3 = jax.random.normal(k2, (1, 4, 32, 64), dtype=jnp.float32)
    t3 = t3.at[0, 1].set(0.0)
    _check(o3, t3, per_buf_budget=32 * 128 * 4)

    print("KERNEL_OK")
</pallas_src>

<mosaic_0001>
module attributes {stable_mosaic.version = 11 : i64} {
  func.func @kernel(%arg0: i32, %arg1: i32, %arg2: i32, %arg3: memref<1x32x32xf32, #tpu.memory_space<vmem>>, %arg4: memref<1x32x32xf32, #tpu.memory_space<vmem>>, %arg5: memref<1x32x1xf32, #tpu.memory_space<vmem>>, %arg6: memref<1x32x1xf32, #tpu.memory_space<vmem>>) attributes {dimension_semantics = [#tpu.dimension_semantics<parallel>, #tpu.dimension_semantics<parallel>, #tpu.dimension_semantics<arbitrary>], iteration_bounds = array<i64: 2, 1, 1>, scalar_prefetch = 0 : i64, scratch_operands = 0 : i64, tpu.core_type = #tpu.core_type<tc>, window_params = [{transform_indices = @transform_0, window_bounds = array<i64: 1, 32, 32>}, {transform_indices = @transform_1, window_bounds = array<i64: 1, 32, 32>}, {transform_indices = @transform_2, window_bounds = array<i64: 1, 32, 1>}, {transform_indices = @transform_3, window_bounds = array<i64: 1, 32, 1>}]} {
    %c0_i32 = arith.constant 0 : i32
    %0 = arith.cmpi eq, %arg2, %c0_i32 : i32
    %1 = arith.extui %0 : i1 to i32
    %c0_i32_0 = arith.constant 0 : i32
    %2 = arith.cmpi ne, %1, %c0_i32_0 : i32
    scf.if %2 {
      %cst_20 = arith.constant 0.000000e+00 : f32
      %21 = vector.broadcast %cst_20 : f32 to vector<1x32x1xf32>
      %c0_21 = arith.constant 0 : index
      %c0_22 = arith.constant 0 : index
      %c0_23 = arith.constant 0 : index
      %22 = vector.load %arg5[%c0_21, %c0_22, %c0_23] : memref<1x32x1xf32, #tpu.memory_space<vmem>>, vector<1x32x1xf32>
      tpu.vector_store %arg5[%c0_21, %c0_22, %c0_23], %21 {strides = array<i32>} : memref<1x32x1xf32, #tpu.memory_space<vmem>>, vector<1x32x1xf32>,
      %cst_24 = arith.constant 0.000000e+00 : f32
      %23 = vector.broadcast %cst_24 : f32 to vector<1x32x1xf32>
      %c0_25 = arith.constant 0 : index
      %c0_26 = arith.constant 0 : index
      %c0_27 = arith.constant 0 : index
      %24 = vector.load %arg6[%c0_25, %c0_26, %c0_27] : memref<1x32x1xf32, #tpu.memory_space<vmem>>, vector<1x32x1xf32>
      tpu.vector_store %arg6[%c0_25, %c0_26, %c0_27], %23 {strides = array<i32>} : memref<1x32x1xf32, #tpu.memory_space<vmem>>, vector<1x32x1xf32>,
    } else {
    }
    %c0 = arith.constant 0 : index
    %c0_1 = arith.constant 0 : index
    %c0_2 = arith.constant 0 : index
    %3 = vector.load %arg3[%c0, %c0_1, %c0_2] : memref<1x32x32xf32, #tpu.memory_space<vmem>>, vector<1x32x32xf32>
    %c0_3 = arith.constant 0 : index
    %c0_4 = arith.constant 0 : index
    %c0_5 = arith.constant 0 : index
    %4 = vector.load %arg4[%c0_3, %c0_4, %c0_5] : memref<1x32x32xf32, #tpu.memory_space<vmem>>, vector<1x32x32xf32>
    %5 = arith.subf %3, %4 : vector<1x32x32xf32>
    %6 = math.absf %5 : vector<1x32x32xf32>
    %cst = arith.constant 0.000000e+00 : f32
    %7 = vector.broadcast %cst : f32 to vector<1x32x32xf32>
    %8 = arith.cmpf one, %4, %7 : vector<1x32x32xf32>
    %9 = arith.extui %8 : vector<1x32x32xi1> to vector<1x32x32xi32>
    %10 = arith.sitofp %9 : vector<1x32x32xi32> to vector<1x32x32xf32>
    %c0_6 = arith.constant 0 : index
    %c0_7 = arith.constant 0 : index
    %c0_8 = arith.constant 0 : index
    %11 = vector.load %arg5[%c0_6, %c0_7, %c0_8] : memref<1x32x1xf32, #tpu.memory_space<vmem>>, vector<1x32x1xf32>
    %cst_9 = arith.constant dense<0.000000e+00> : vector<1x32xf32>
    %12 = vector.multi_reduction <add>, %6, %cst_9 [2] : vector<1x32x32xf32> to vector<1x32xf32>
    %13 = vector.shape_cast %12 : vector<1x32xf32> to vector<1x32x1xf32>
    %14 = arith.addf %11, %13 : vector<1x32x1xf32>
    %c0_10 = arith.constant 0 : index
    %c0_11 = arith.constant 0 : index
    %c0_12 = arith.constant 0 : index
    %15 = vector.load %arg5[%c0_10, %c0_11, %c0_12] : memref<1x32x1xf32, #tpu.memory_space<vmem>>, vector<1x32x1xf32>
    tpu.vector_store %arg5[%c0_10, %c0_11, %c0_12], %14 {strides = array<i32>} : memref<1x32x1xf32, #tpu.memory_space<vmem>>, vector<1x32x1xf32>,
    %c0_13 = arith.constant 0 : index
    %c0_14 = arith.constant 0 : index
    %c0_15 = arith.constant 0 : index
    %16 = vector.load %arg6[%c0_13, %c0_14, %c0_15] : memref<1x32x1xf32, #tpu.memory_space<vmem>>, vector<1x32x1xf32>
    %cst_16 = arith.constant dense<0.000000e+00> : vector<1x32xf32>
    %17 = vector.multi_reduction <add>, %10, %cst_16 [2] : vector<1x32x32xf32> to vector<1x32xf32>
    %18 = vector.shape_cast %17 : vector<1x32xf32> to vector<1x32x1xf32>
    %19 = arith.addf %16, %18 : vector<1x32x1xf32>
    %c0_17 = arith.constant 0 : index
    %c0_18 = arith.constant 0 : index
    %c0_19 = arith.constant 0 : index
    %20 = vector.load %arg6[%c0_17, %c0_18, %c0_19] : memref<1x32x1xf32, #tpu.memory_space<vmem>>, vector<1x32x1xf32>
    tpu.vector_store %arg6[%c0_17, %c0_18, %c0_19], %19 {strides = array<i32>} : memref<1x32x1xf32, #tpu.memory_space<vmem>>, vector<1x32x1xf32>,
    return
  }
  func.func @transform_0(%arg0: i32, %arg1: i32, %arg2: i32) -> (i32, i32, i32) {
    %c1_i32 = arith.constant 1 : i32
    %0 = arith.muli %arg1, %c1_i32 : i32
    %1 = arith.addi %0, %arg2 : i32
    %c0_i32 = arith.constant 0 : i32
    %c0_i32_0 = arith.constant 0 : i32
    return %arg0, %c0_i32, %1 : i32, i32, i32
  }
  func.func @transform_1(%arg0: i32, %arg1: i32, %arg2: i32) -> (i32, i32, i32) {
    %c1_i32 = arith.constant 1 : i32
    %0 = arith.muli %arg1, %c1_i32 : i32
    %1 = arith.addi %0, %arg2 : i32
    %c0_i32 = arith.constant 0 : i32
    %c0_i32_0 = arith.constant 0 : i32
    return %arg0, %c0_i32, %1 : i32, i32, i32
  }
  func.func @transform_2(%arg0: i32, %arg1: i32, %arg2: i32) -> (i32, i32, i32) {
    %c1_i32 = arith.constant 1 : i32
    %0 = arith.muli %arg0, %c1_i32 : i32
    %1 = arith.addi %0, %arg1 : i32
    %c0_i32 = arith.constant 0 : i32
    %c0_i32_0 = arith.constant 0 : i32
    %c0_i32_1 = arith.constant 0 : i32
    return %1, %c0_i32, %c0_i32_0 : i32, i32, i32
  }
  func.func @transform_3(%arg0: i32, %arg1: i32, %arg2: i32) -> (i32, i32, i32) {
    %c1_i32 = arith.constant 1 : i32
    %0 = arith.muli %arg0, %c1_i32 : i32
    %1 = arith.addi %0, %arg1 : i32
    %c0_i32 = arith.constant 0 : i32
    %c0_i32_0 = arith.constant 0 : i32
    %c0_i32_1 = arith.constant 0 : i32
    return %1, %c0_i32, %c0_i32_0 : i32, i32, i32
  }
}

</mosaic_0001>

<bundles_post_ra>
// kernel: tpu_custom_call.1
= control target key start
LH: loop header
LB: loop body
LE: loop exit
PB: predicated region body
PF: predicated region fallthrough
CT: control target
= control target key end

     0   :  { %9 = vsyncpa [#allocation3], 0  ;;  %s920_s0 = inlined_call_operand.hbm [shape: f32[2,32,32], index: 0, kind: input, shape index: {}]   ;;  %s921_s1 = inlined_call_operand.hbm [shape: f32[2,32,32], index: 1, kind: input, shape index: {}]   ;;  %s922_s2 = inlined_call_operand.vmem [shape: f32[2,32,1], index: 2, kind: output, shape index: {0}]   ;;  %s923_s3 = inlined_call_operand.vmem [shape: f32[2,32,1], index: 3, kind: output, shape index: {1}]  }
   0x1   :  { %11 = vsyncpa [#allocation3 + $0x1], 0 }
   0x2   :  { %12 = vsyncpa [#allocation5], 0 }
   0x3   :  { %14 = vsyncpa [#allocation5 + $0x1], 0  ;;  %s757_s12 = smov 0   ;;  %s759_s13 = smov 0  }
   0x4   :  { %s761_s14 = smov 0   ;;  %s763_s15 = smov 0  }
   0x5   :  { %s765_s16 = smov 0   ;;  %s767_s17 = smov 0  }
   0x6 LB: > { %s528_s18 = sadd.s32 4294967295, %s732_s17   ;;  %s39_s19 = sadd.s32 1, %s728_s16  ;;  %s732_s17 = sphi %s767_s17, %s20_s17   ;;  %s728_s16 = sphi %s765_s16, %s931_s16   ;;  %s724_s15 = sphi %s763_s15, %s930_s15   ;;  %s720_s14 = sphi %s761_s14, %s929_s14   ;;  %s716_s13 = sphi %s759_s13, %s928_s13   ;;  %s712_s12 = sphi %s757_s12, %s927_s12  }
   0x7   : > { %p41_p0 = scmp.ge.s32.totalorder %s39_s19, 2  ;;  %s50_s20 = sadd.s32 1, %s720_s14 }
   0x8   : > { %p57_p1 = scmp.ne.s32.totalorder %s720_s14, %s716_s13  ;;  %p58_p2 = scmp.eq.s32.totalorder %s732_s17, 0 }
   0x9   : > { %s933_s19 = smov (%p41_p0, %s39_s19), 0  ;;  %p63_p4 = scmp.ne.s32.totalorder %s716_s13, %s712_s12 }
   0xa   : > { %p793_p3 = por %p58_p2, %p57_p1  ;;  %s45_s22 = ssub.s32 %s728_s16, %s933_s19 }
   0xb   : > { %p64_p5 = scmp.eq.s32.totalorder %s528_s18, 0  ;;  %p48_p6 = scmp.eq.s32.totalorder %s45_s22, 0 }
   0xc   : > { %p566_p8 = scmp.lt.s32.totalorder %s732_s17, 2  ;;  %s809_s25 = sand.u32 1, %s720_s14  }
   0xd   : > { %p800_p7 = por %p64_p5, %p63_p4  ;;  %s551_s26 = sshll.u32 %s728_s16, 5 }
   0xe   : > { %s806_s24 = scalar_select %p48_p6, %s720_s14, %s50_s20  }
   0xf   : > { %s532_s27 = sshll.u32 %s809_s25, 5  ;;  %s184_s30 = scalar_lea.hbm %s920_s0, %s551_s26 }
  0x10   : > { %s185_s4 = sshll.u32 %s184_s30, 4  ;;  %s177_s5 = scalar_lea.vmem [#allocation2], %s532_s27  ;;  %s186_s4 = int_to_ptr.hbm [resolvable:$true] %s185_s4 }
  0x11   : > { %s187_s6 = sshll.u32 %s177_s5, 4  ;;  %p818_p9 = pnand %p566_p8, %p793_p3  ;;  %s188_s6 = int_to_ptr.vmem [resolvable:$true] %s187_s6 }
  0x12   : > { %p538_p10 = scmp.ge.s32.totalorder %s732_s17, 1  ;;  %p219_p11 = scmp.lt.s32.totalorder %s732_s17, 3 }
  0x13   : > { %s174_s8 = scalar_lea.sflag [#allocation3], %s809_s25  ;;  %s734_s9 = smov 128  }
  0x14   : > { %s735_s10 = smov 8   ;;  %p220_p12 = pnand %p538_p10, %p219_p11 }
  0x15   : > { %562 = dma.hbm_to_vmem [thread:$0]  (!%p818_p9), %s186_s4, 512, %s188_s6, %s174_s8, %s734_s9, %s734_s9, %s735_s10  }
  0x16   : > { %s208_s18 = scalar_lea.hbm %s921_s1, %s551_s26  ;;  %s201_s21 = scalar_lea.vmem [#allocation4], %s532_s27 }
  0x17   : > { %s209_s20 = sshll.u32 %s208_s18, 4  ;;  %s211_s22 = sshll.u32 %s201_s21, 4  ;;  %s210_s20 = int_to_ptr.hbm [resolvable:$true] %s209_s20  ;;  %s212_s22 = int_to_ptr.vmem [resolvable:$true] %s211_s22 }
  0x18   : > { %s198_s28 = scalar_lea.sflag [#allocation5], %s809_s25  ;;  %223 = sbr.rel (%p220_p12) target bundleno = 175 (0xaf), region = 28 }
  0x19   : > { %565 = dma.hbm_to_vmem [thread:$0]  (!%p818_p9), %s210_s20, 512, %s212_s22, %s198_s28, %s734_s9, %s734_s9, %s735_s10  }
  0x1a   : > { %s225_s29 = sand.u32 (!%p220_p12), 1, %s716_s13  }
  0x1b   : > { %s539_s30 = sshll.u32 (!%p220_p12), %s225_s29, 5  ;;  %s226_s5 = scalar_lea.sflag (!%p220_p12), [#allocation3], %s225_s29 }
  0x1c   : > { %s229_s4 = scalar_lea.vmem (!%p220_p12), [#allocation2], %s539_s30 }
  0x1d   : > { %703 = dma.done.wait (%p800_p7), %s226_s5, 512  }
  0x1e   : > { %705 = vsyncadd (%p800_p7), %s226_s5, 4294966784  ;;  %s236_s26 = scalar_lea.sflag [#allocation5], %s225_s29  ;;  %s239_s27 = scalar_lea.vmem [#allocation4], %s539_s30 }
  0x1f   : > { %707 = dma.done.wait (%p800_p7), %s236_s26, 512  }
  0x20   : > { %709 = vsyncadd (%p800_p7), %s236_s26, 4294966784  ;;  %p278_p13 = scmp.lt.s32.totalorder %s724_s15, 1  ;;  %vm295_vm0 = vcmask 7168   ;;  %v736_v0 = vmov 0.0   ;;  %v306_v1 = vld [vmem:[%s229_s4 + $0x10] sm:$0xff]  ;;  %v304_v3 = vld [vmem:[%s229_s4] sm:$0xff] }
  0x21   : > { %v310_v2 = vld [vmem:[%s239_s27 + $0x10] sm:$0xff]  ;;  %v308_v5 = vld [vmem:[%s239_s27] sm:$0xff]  ;;  %v307_v6 = vld [vmem:[%s229_s4 + $0x18] sm:$0xff]  ;;  %vm336_vm1 = vcmask 261120  }
  0x22   : > { %s935_s15 = smov (!%p278_p13, %s724_s15), 1  ;;  %v314_v4 = vsub.f32 %v306_v1, %v310_v2  ;;  %v311_v7 = vld [vmem:[%s239_s27 + $0x18] sm:$0xff]  ;;  %v312_v8 = vsub.f32 %v304_v3, %v308_v5  ;;  %vm320_vm2 = vcmp.ne.f32.partialorder %v308_v5, 0.0  ;;  %v305_v9 = vld [vmem:[%s229_s4 + $0x8] sm:$0xff]  ;;  %vm322_vm5 = vcmp.ne.f32.partialorder %v310_v2, 0.0 }
  0x23   : > { %s553_s25 = sshll.u32 %s935_s15, 5  ;;  %v309_v10 = vld [vmem:[%s239_s27 + $0x8] sm:$0xff]  ;;  %v545_v12 = vsel %vm320_vm2, 1.0, %v736_v0  ;;  %v315_v13 = vsub.f32 %v307_v6, %v311_v7  ;;  %vm323_vm4 = vcmp.ne.f32.partialorder %v311_v7, 0.0  ;;  %v547_v26 = vsel %vm322_vm5, 1.0, %v736_v0 }
  0x24   : > { %s847_s8 = scalar_lea.vmem %s922_s2, %s553_s25  ;;  %s856_s15 = scalar_lea.vmem %s923_s3, %s553_s25  ;;  %v318_v11 = vand.u32 2147483647, %v314_v4  ;;  %v316_v14 = vand.u32 2147483647, %v312_v8  ;;  %v362_v15 = vsel %vm336_vm1, %v545_v12, 0.0  ;;  %v313_v16 = vsub.f32 %v305_v9, %v309_v10 }
  0x25   : > { %298 = vst.msk [vmem:[%s847_s8 + $0x10] sm:$0xff] %vm295_vm0, %v736_v0  ;;  %vm321_vm3 = vcmp.ne.f32.partialorder %v309_v10, 0.0  ;;  %363 = vadd.xlane.f32.xlu2 %v362_v15  ;;  %v319_v19 = vand.u32 2147483647, %v315_v13  ;;  %v548_v25 = vsel %vm323_vm4, 1.0, %v736_v0  ;;  %v368_v28 = vsel %vm336_vm1, %v547_v26, 0.0 }
  0x26   : > { %296 = vst.msk [vmem:[%s847_s8] sm:$0xff] %vm295_vm0, %v736_v0  ;;  %v343_v17 = vsel %vm336_vm1, %v318_v11, 0.0  ;;  %v337_v18 = vsel %vm336_vm1, %v316_v14, 0.0  ;;  %v546_v20 = vsel %vm321_vm3, 1.0, %v736_v0  ;;  %v317_v21 = vand.u32 2147483647, %v313_v16 }
  0x27   : > { %297 = vst.msk [vmem:[%s847_s8 + $0x8] sm:$0xff] %vm295_vm0, %v736_v0  ;;  %344 = vadd.xlane.f32.xlu1 %v343_v17  ;;  %338 = vadd.xlane.f32.xlu0 %v337_v18  ;;  %v365_v22 = vsel %vm336_vm1, %v546_v20, 0.0  ;;  %v346_v23 = vsel %vm336_vm1, %v319_v19, 0.0  ;;  %v371_v27 = vsel %vm336_vm1, %v548_v25, 0.0 }
  0x28   : > { %299 = vst.msk [vmem:[%s847_s8 + $0x18] sm:$0xff] %vm295_vm0, %v736_v0  ;;  %v340_v24 = vsel %vm336_vm1, %v317_v21, 0.0 }
  0x29   : > { %300 = vst.msk [vmem:[%s856_s15] sm:$0xff] %vm295_vm0, %v736_v0 }
  0x2a   : > { %301 = vst.msk [vmem:[%s856_s15 + $0x8] sm:$0xff] %vm295_vm0, %v736_v0 }
  0x2b   : > { %302 = vst.msk [vmem:[%s856_s15 + $0x10] sm:$0xff] %vm295_vm0, %v736_v0 }
  0x2c   : > { %303 = vst.msk [vmem:[%s856_s15 + $0x18] sm:$0xff] %vm295_vm0, %v736_v0  ;;  %v334_v30 = vld [vmem:[%s847_s8 + $0x10] sm:$0xff] }
  0x2d   : > { %366 = vadd.xlane.f32.xlu2 %v365_v22  ;;  %v332_v31 = vld [vmem:[%s847_s8] sm:$0xff] }
  0x2e   : > { %v333_v40 = vld [vmem:[%s847_s8 + $0x8] sm:$0xff] }
  0x2f   : > { %347 = vadd.xlane.f32.xlu1 %v346_v23  ;;  %341 = vadd.xlane.f32.xlu0 %v340_v24  ;;  %v335_v39 = vld [vmem:[%s847_s8 + $0x18] sm:$0xff] }
  0x30   : > { %v358_v29 = vld [vmem:[%s856_s15] sm:$0xff] }
  0x31   : > { %v359_v38 = vld [vmem:[%s856_s15 + $0x8] sm:$0xff] }
  0x32   : > { %v360_v48 = vld [vmem:[%s856_s15 + $0x10] sm:$0xff] }
  0x33   : > { %v361_v47 = vld [vmem:[%s856_s15 + $0x18] sm:$0xff] }
  0x37   : > { %372 = vadd.xlane.f32.xlu1 %v371_v27  ;;  %369 = vadd.xlane.f32.xlu0 %v368_v28 }
  0x98   : > { %v364_v32 = vpop.xlane.xlu2 %363 }
  0x99   : > { %v374_v34 = vadd.f32 %v364_v32, %v358_v29 }
  0x9a   : > { %v345_v33 = vpop.xlane.xlu1 %344  ;;  %v339_v36 = vpop.xlane.xlu0 %338 }
  0x9b   : > { %v351_v35 = vadd.f32 %v345_v33, %v334_v30  ;;  %v349_v37 = vadd.f32 %v339_v36, %v332_v31  ;;  %378 = vst.msk [vmem:[%s856_s15] sm:$0xff] %vm295_vm0, %v374_v34 }
  0x9d   : > { %356 = vst.msk [vmem:[%s847_s8 + $0x10] sm:$0xff] %vm295_vm0, %v351_v35 }
  0x9e   : > { %354 = vst.msk [vmem:[%s847_s8] sm:$0xff] %vm295_vm0, %v349_v37 }
  0xa0   : > { %v367_v41 = vpop.xlane.xlu2 %366 }
  0xa1   : > { %v375_v43 = vadd.f32 %v367_v41, %v359_v38 }
  0xa2   : > { %v348_v42 = vpop.xlane.xlu1 %347  ;;  %v342_v45 = vpop.xlane.xlu0 %341 }
  0xa3   : > { %v352_v44 = vadd.f32 %v348_v42, %v335_v39  ;;  %v350_v46 = vadd.f32 %v342_v45, %v333_v40  ;;  %379 = vst.msk [vmem:[%s856_s15 + $0x8] sm:$0xff] %vm295_vm0, %v375_v43 }
  0xa5   : > { %357 = vst.msk [vmem:[%s847_s8 + $0x18] sm:$0xff] %vm295_vm0, %v352_v44 }
  0xa6   : > { %355 = vst.msk [vmem:[%s847_s8 + $0x8] sm:$0xff] %vm295_vm0, %v350_v46 }
  0xaa   : > { %v373_v49 = vpop.xlane.xlu1 %372  ;;  %v370_v51 = vpop.xlane.xlu0 %369 }
  0xab   : > { %v377_v50 = vadd.f32 %v373_v49, %v361_v47  ;;  %v376_v52 = vadd.f32 %v370_v51, %v360_v48 }
  0xad   : > { %381 = vst.msk [vmem:[%s856_s15 + $0x18] sm:$0xff] %vm295_vm0, %v377_v50 }
  0xae   : > { %380 = vst.msk [vmem:[%s856_s15 + $0x10] sm:$0xff] %vm295_vm0, %v376_v52 }
  0xaf PF: > { %s20_s17 = sadd.s32 1, %s732_s17   ;;  %s927_s12 = smov %s716_s13 }
  0xb0   : > { %p17_p0 = scmp.ge.s32.totalorder %s20_s17, 4   ;;  %s928_s13 = smov %s720_s14 }
  0xb1   : > { %s929_s14 = smov %s806_s24  ;;  %s930_s15 = smov %s728_s16 }
  0xb2   : > { %s931_s16 = smov %s933_s19  ;;  %19 = sbr.rel (!%p17_p0) target bundleno = 6 (0x6), region = 97 }
  0xb7   :  { %425 = vsyncpa [#allocation3], 1 }
  0xb8   :  { %427 = vsyncpa [#allocation3 + $0x1], 1 }
  0xb9   :  { %428 = vsyncpa [#allocation5], 1 }
  0xba   :  { %430 = vsyncpa [#allocation5 + $0x1], 1 }

</bundles_post_ra>
